<compile_context>
chip_gen: v5e
topology: v5e:2x2
jax: 0.10.0
libtpu: 0.0.40
codegen_flags: <defaults>
</compile_context>

<pallas_src>
import math

import jax
import jax.numpy as jnp
from jax.experimental import pallas as pl
from jax.experimental.pallas import tpu as pltpu


def _conv_full_kernel(x_ref, w_ref, o_ref):
    # x_ref: (16, tile_n) -- 16 filter taps in sublanes, batch planes in lanes.
    # w_ref: (16, 1)      -- flattened 4x4 conv filter, broadcast over lanes.
    # o_ref: (1, tile_n)  -- lane-dense per-plane results.
    prod = x_ref[...].astype(jnp.float32) * w_ref[...].astype(jnp.float32)
    o_ref[...] = jnp.sum(prod, axis=0, keepdims=True)   # XLU sublane reduce


def test_conv_forward(x_nchw, weight, *, tile_n=512):
    """Full-window conv forward matching nn.Conv2d(1, 1, 4, bias=False).

    x_nchw: (N, 1, 4, 4) float32 (N=1 matches the PyTorch module exactly).
    weight: (1, 1, 4, 4) float32 conv filter.
    Returns (N, 1, 1, 1) float32.
    """
    n = x_nchw.shape[0]
    assert x_nchw.shape[1:] == (1, 4, 4), x_nchw.shape
    assert weight.shape == (1, 1, 4, 4), weight.shape

    # Layout plumbing (wrapper-side, not compute): batch -> lanes, taps -> sublanes.
    x_t = x_nchw.reshape(n, 16).astype(jnp.float32).T     # (16, N)
    w_t = weight.reshape(16, 1).astype(jnp.float32)       # (16, 1)

    # Lane-aligned batch tile.  n <= tile_n -> one full-array block (always legal,
    # no (8,128)-divisibility requirement).  Otherwise tile_n is a multiple of 128
    # and a ragged last tile falls back to Pallas' padded/masked partial-block
    # semantics (each output lane depends only on its own input column, so padded
    # reads only feed masked-out lanes).
    tn = n if n <= tile_n else tile_n
    grid = (pl.cdiv(n, tn),)

    out = pl.pallas_call(
        _conv_full_kernel,
        out_shape=jax.ShapeDtypeStruct((1, n), jnp.float32),
        grid=grid,
        in_specs=[
            pl.BlockSpec((16, tn), lambda i: (0, i)),   # batch tile i
            pl.BlockSpec((16, 1), lambda i: (0, 0)),    # filter, resident across tiles
        ],
        out_specs=pl.BlockSpec((1, tn), lambda i: (0, i)),
        compiler_params=pltpu.CompilerParams(
            dimension_semantics=("parallel",),
        ),
        cost_estimate=pl.CostEstimate(
            flops=31 * n,                                # 16 mul + 15 add per plane
            transcendentals=0,
            bytes_accessed=16 * n * 4 + 64 + n * 4,
        ),
    )(x_t, w_t)

    return out.reshape(n, 1, 1, 1)


def init_conv_weight(key):
    """Deterministic init mimicking nn.Conv2d default (kaiming uniform).

    fan_in = in_channels * k * k = 16, bound = 1/sqrt(fan_in).
    """
    fan_in = 1 * 4 * 4
    bound = 1.0 / math.sqrt(fan_in)
    return jax.random.uniform(
        key, (1, 1, 4, 4), dtype=jnp.float32, minval=-bound, maxval=bound
    )


if __name__ == "__main__":
    key = jax.random.PRNGKey(0)
    k_w, k_x1, k_xn = jax.random.split(key, 3)

    weight = init_conv_weight(k_w)                            # (1, 1, 4, 4)

    # --- Module-exact case: batch 1, same semantics as Test_Conv.forward ---
    x1 = jax.random.normal(k_x1, (1, 1, 4, 4), jnp.float32)   # NCHW input
    y1 = jax.block_until_ready(test_conv_forward(x1, weight))
    ref1 = jnp.sum(x1 * weight).reshape(1, 1, 1, 1)
    assert y1.shape == (1, 1, 1, 1)
    assert jnp.allclose(y1, ref1, atol=1e-5), (y1, ref1)

    # --- Batched case: exercises the lane-tiled grid path (2 tiles of 128 lanes) ---
    nb = 256
    xn = jax.random.normal(k_xn, (nb, 1, 4, 4), jnp.float32)
    yn = jax.block_until_ready(test_conv_forward(xn, weight, tile_n=128))
    refn = jnp.sum(xn * weight, axis=(1, 2, 3)).reshape(nb, 1, 1, 1)
    assert yn.shape == (nb, 1, 1, 1)
    assert jnp.allclose(yn, refn, atol=1e-5)

    # TODO(synk): the PyTorch module's debug print() calls are host-side I/O with no
    # kernel equivalent and are intentionally omitted.
    print("KERNEL_OK")
</pallas_src>

<mosaic_0001>
module attributes {stable_mosaic.version = 11 : i64} {
  func.func @_conv_full_kernel(%arg0: i32, %arg1: memref<16x1xf32, #tpu.memory_space<vmem>>, %arg2: memref<16x1xf32, #tpu.memory_space<vmem>>, %arg3: memref<1x1xf32, #tpu.memory_space<vmem>>) attributes {dimension_semantics = [#tpu.dimension_semantics<parallel>], iteration_bounds = array<i64: 1>, scalar_prefetch = 0 : i64, scratch_operands = 0 : i64, tpu.core_type = #tpu.core_type<tc>, window_params = [{transform_indices = @transform_0, window_bounds = array<i64: 16, 1>}, {pipeline_mode = #tpu.pipeline_mode<synchronous>, transform_indices = @transform_1, window_bounds = array<i64: 16, 1>}, {transform_indices = @transform_2, window_bounds = array<i64: 1, 1>}]} {
    %c0 = arith.constant 0 : index
    %c0_0 = arith.constant 0 : index
    %0 = vector.load %arg1[%c0, %c0_0] : memref<16x1xf32, #tpu.memory_space<vmem>>, vector<16x1xf32>
    %c0_1 = arith.constant 0 : index
    %c0_2 = arith.constant 0 : index
    %1 = vector.load %arg2[%c0_1, %c0_2] : memref<16x1xf32, #tpu.memory_space<vmem>>, vector<16x1xf32>
    %2 = arith.mulf %0, %1 : vector<16x1xf32>
    %cst = arith.constant dense<0.000000e+00> : vector<1xf32>
    %3 = vector.multi_reduction <add>, %2, %cst [0] : vector<16x1xf32> to vector<1xf32>
    %4 = vector.shape_cast %3 : vector<1xf32> to vector<1x1xf32>
    %c0_3 = arith.constant 0 : index
    %c0_4 = arith.constant 0 : index
    %5 = vector.load %arg3[%c0_3, %c0_4] : memref<1x1xf32, #tpu.memory_space<vmem>>, vector<1x1xf32>
    tpu.vector_store %arg3[%c0_3, %c0_4], %4 {strides = array<i32>} : memref<1x1xf32, #tpu.memory_space<vmem>>, vector<1x1xf32>,
    return
  }
  func.func @transform_0(%arg0: i32) -> (i32, i32) {
    %c0_i32 = arith.constant 0 : i32
    %c0_i32_0 = arith.constant 0 : i32
    return %c0_i32, %arg0 : i32, i32
  }
  func.func @transform_1(%arg0: i32) -> (i32, i32) {
    %c0_i32 = arith.constant 0 : i32
    %c0_i32_0 = arith.constant 0 : i32
    %c0_i32_1 = arith.constant 0 : i32
    return %c0_i32, %c0_i32_0 : i32, i32
  }
  func.func @transform_2(%arg0: i32) -> (i32, i32) {
    %c0_i32 = arith.constant 0 : i32
    %c0_i32_0 = arith.constant 0 : i32
    return %c0_i32, %arg0 : i32, i32
  }
}

</mosaic_0001>

<bundles_post_ra>
// kernel: tpu_custom_call.1
= control target key start
LH: loop header
LB: loop body
LE: loop exit
PB: predicated region body
PF: predicated region fallthrough
CT: control target
= control target key end

     0   :  { %vm18_vm0 = vcmask 7168   ;;  %s104_s0 = inlined_call_operand.vmem [shape: f32[16,1], index: 0, kind: input, shape index: {}]   ;;  %s105_s1 = inlined_call_operand.vmem [shape: f32[16,1], index: 1, kind: input, shape index: {}]   ;;  %s106_s2 = inlined_call_operand.hbm [shape: f32[1,1], index: 2, kind: output, shape index: {}]  }
   0x1   :  { %v12_v0 = vld [vmem:[%s104_s0] sm:$0xff]  ;;  %v13_v1 = vld [vmem:[%s104_s0 + $0x8] sm:$0xff] }
   0x2   :  { %v14_v2 = vld [vmem:[%s105_s1] sm:$0xff]  ;;  %v15_v3 = vld [vmem:[%s105_s1 + $0x8] sm:$0xff] }
   0x3   :  { %v16_v4 = vmul.f32 %v14_v2, %v12_v0 }
   0x4   :  { %7 = vsyncpa [#allocation3], 0  ;;  %v17_v5 = vmul.f32 %v15_v3, %v13_v1  ;;  %s73_s0 = smov [#allocation2]   ;;  %s37_s20 = sshll.u32 %s106_s2, 4  ;;  %vm28_vm1 = vcmask 0   ;;  %s38_s20 = int_to_ptr.hbm [resolvable:$true] %s37_s20 }
   0x5   :  { %v19_v6 = vsel %vm18_vm0, %v16_v4, 0.0  ;;  %s35_s17 = sshll.u32 %s73_s0, 4  ;;  %s36_s17 = int_to_ptr.vmem [resolvable:$true] %s35_s17 }
   0x6   :  { %v20_v7 = vsel %vm18_vm0, %v17_v5, 0.0 }
   0x7   :  { %v21_v8 = vadd.f32 %v20_v7, %v19_v6 }
   0x9   :  { %v22_v9 = vrot.slane %v21_v8, 4 }
   0xb   :  { %v23_v10 = vadd.f32 %v22_v9, %v21_v8 }
   0xd   :  { %v24_v11 = vrot.slane %v23_v10, 2 }
   0xf   :  { %v25_v12 = vadd.f32 %v24_v11, %v23_v10 }
  0x11   :  { %v26_v13 = vrot.slane %v25_v12, 1 }
  0x13   :  { %v27_v14 = vadd.f32 %v26_v13, %v25_v12 }
  0x15   :  { %29 = vst.msk [vmem:[#allocation2] sm:$0x1] %vm28_vm1, %v27_v14 }
  0x16   :  { %40 = dma.vmem_to_hbm [thread:$0]  %s36_s17, 16, %s38_s20, [#allocation3]  }
  0x17   :  { %71 = dma.done.wait [#allocation3], 16  }
  0x18   :  { %72 = vsyncadd [#allocation3], 4294967280 }
  0x19   :  { %45 = vsyncpa [#allocation3], 1 }

</bundles_post_ra>
